<compile_context>
chip_gen: v6e
topology: v6e:2x2x1
jax: 0.10.0
libtpu: 0.0.40
codegen_flags: <defaults>
</compile_context>

<pallas_src>
import jax
import jax.numpy as jnp
from jax.experimental import pallas as pl
from jax.experimental.pallas import tpu as pltpu


_NEG_PAD = -1e30  # padding for extra vocab lanes; exp(pad - max) underflows to exactly 0


def _round_up(x, m):
    return ((x + m - 1) // m) * m


def _make_ce_kernel(R, Vpad, BT):
    """Training path: one grid step == R (batch*time) rows."""

    def kernel(idx_ref, tgt_ref, tbl_ref, logits_ref, nll_ref):
        i = pl.program_id(0)
        idx_col = idx_ref[...]                                   # (R, 1) int32
        tgt_col = tgt_ref[...]                                   # (R, 1) int32
        table = tbl_ref[...]                                     # (Vpad, Vpad) f32, VMEM-resident

        lanes = jax.lax.broadcasted_iota(jnp.int32, (R, Vpad), 1)
        onehot = (lanes == idx_col).astype(jnp.float32)          # (R, Vpad)
        # Row gather via MXU; HIGHEST precision keeps the gathered f32 rows exact.
        logits = jnp.dot(onehot, table,
                         preferred_element_type=jnp.float32,
                         precision=jax.lax.Precision.HIGHEST)    # (R, Vpad)
        logits_ref[...] = logits

        # Cross-entropy in f32, vectorized over the whole row block.
        m = jnp.max(logits, axis=-1, keepdims=True)              # (R, 1)
        s = jnp.sum(jnp.exp(logits - m), axis=-1, keepdims=True) # (R, 1)
        lse = m + jnp.log(s)                                     # (R, 1)
        picked = jnp.sum(jnp.where(lanes == tgt_col, logits, 0.0),
                         axis=-1, keepdims=True)                 # (R, 1)
        nll = lse - picked                                       # (R, 1)

        # Mask padded rows (>= BT) and reduce to a single lane-dense partial sum.
        row_ids = i * R + jax.lax.broadcasted_iota(jnp.int32, (R, 128), 0)
        nll_b = jnp.broadcast_to(nll, (R, 128))
        nll_b = jnp.where(row_ids < BT, nll_b, 0.0)
        nll_ref[...] = jnp.sum(nll_b, axis=0, keepdims=True)     # (1, 128)

    return kernel


def _make_logits_kernel(R, Vpad):
    """Inference path: pure blocked row gather, no cross-entropy work."""

    def kernel(idx_ref, tbl_ref, logits_ref):
        idx_col = idx_ref[...]                                   # (R, 1) int32
        table = tbl_ref[...]                                     # (Vpad, Vpad) f32
        lanes = jax.lax.broadcasted_iota(jnp.int32, (R, Vpad), 1)
        onehot = (lanes == idx_col).astype(jnp.float32)
        logits_ref[...] = jnp.dot(onehot, table,
                                  preferred_element_type=jnp.float32,
                                  precision=jax.lax.Precision.HIGHEST)

    return kernel


class BigramLanguageModel:
    """Pallas-TPU implementation of the PyTorch BigramLanguageModel forward pass."""

    def __init__(self, vocab_size, key):
        self.vocab_size = vocab_size
        self.vpad = _round_up(vocab_size, 128)
        # nn.Embedding default init: N(0, 1)
        self.weight = jax.random.normal(key, (vocab_size, vocab_size), dtype=jnp.float32)
        # Pad ONCE at init (hoisted out of the per-call path).
        #  - columns (lane dim) padded with a large negative -> logsumexp ignores them exactly
        #  - rows padded with zeros (never selected by the one-hot)
        tp = jnp.pad(self.weight, ((0, 0), (0, self.vpad - vocab_size)),
                     constant_values=_NEG_PAD)
        self.table_p = jnp.pad(tp, ((0, self.vpad - vocab_size), (0, 0)))

    def _row_block(self, bt):
        r = min(512, _round_up(bt, 8))
        # Keep the double-buffered (R, Vpad) logits block small relative to VMEM
        # (v7x has only 64 MiB physical / 32 MiB default scoped).
        max_block_bytes = 4 << 20
        r_cap = max(8, (max_block_bytes // (self.vpad * 4)) // 8 * 8)
        return max(8, min(r, r_cap))

    def __call__(self, idx, targets=None):
        B, T = idx.shape
        V, Vpad = self.vocab_size, self.vpad
        BT = B * T
        R = self._row_block(BT)
        BT_pad = _round_up(BT, R)
        G = BT_pad // R

        idx_col = jnp.pad(idx.reshape(BT).astype(jnp.int32),
                          (0, BT_pad - BT)).reshape(BT_pad, 1)

        tbl_spec = pl.BlockSpec((Vpad, Vpad), lambda i: (0, 0))   # VMEM-resident table
        row_spec = pl.BlockSpec((R, 1), lambda i: (i, 0))         # idx / targets column
        logit_spec = pl.BlockSpec((R, Vpad), lambda i: (i, 0))    # sublane+lane dense
        cparams = pltpu.CompilerParams(dimension_semantics=("parallel",))

        if targets is None:
            cost = pl.CostEstimate(
                flops=2 * BT_pad * Vpad * Vpad,
                transcendentals=0,
                bytes_accessed=Vpad * Vpad * 4 + BT_pad * 4 + BT_pad * Vpad * 4)
            logits_p = pl.pallas_call(
                _make_logits_kernel(R, Vpad),
                out_shape=jax.ShapeDtypeStruct((BT_pad, Vpad), jnp.float32),
                grid_spec=pltpu.PrefetchScalarGridSpec(
                    num_scalar_prefetch=0, grid=(G,),
                    in_specs=[row_spec, tbl_spec],
                    out_specs=logit_spec),
                compiler_params=cparams,
                cost_estimate=cost,
            )(idx_col, self.table_p)
            logits = logits_p[:BT, :V].reshape(B, T, V)
            return logits, None

        tgt_col = jnp.pad(targets.reshape(BT).astype(jnp.int32),
                          (0, BT_pad - BT)).reshape(BT_pad, 1)
        cost = pl.CostEstimate(
            flops=2 * BT_pad * Vpad * Vpad + 6 * BT_pad * Vpad,
            transcendentals=BT_pad * Vpad + BT_pad,
            bytes_accessed=(Vpad * Vpad * 4 + 2 * BT_pad * 4
                            + BT_pad * Vpad * 4 + G * 512))
        logits_p, nll_part = pl.pallas_call(
            _make_ce_kernel(R, Vpad, BT),
            out_shape=(jax.ShapeDtypeStruct((BT_pad, Vpad), jnp.float32),
                       jax.ShapeDtypeStruct((G, 1, 128), jnp.float32)),
            grid_spec=pltpu.PrefetchScalarGridSpec(
                num_scalar_prefetch=0, grid=(G,),
                in_specs=[row_spec, row_spec, tbl_spec],
                out_specs=(logit_spec,
                           pl.BlockSpec((None, 1, 128), lambda i: (i, 0, 0)))),
            compiler_params=cparams,
            cost_estimate=cost,
        )(idx_col, tgt_col, self.table_p)

        # PyTorch returns the flattened (B*T, C) logits view when targets are given.
        logits = logits_p[:BT, :V]
        loss = jnp.sum(nll_part[:, 0, 0]) / BT
        return logits, loss

    # TODO(synk): `generate` (autoregressive torch.multinomial sampling loop) is
    # host-side control flow and is not implemented as a kernel.


if __name__ == "__main__":
    key = jax.random.PRNGKey(0)
    k_table, k_idx, k_tgt = jax.random.split(key, 3)

    vocab_size = 65          # tiny-shakespeare character vocab
    B, T = 2, 8

    model = BigramLanguageModel(vocab_size, k_table)
    idx = jax.random.randint(k_idx, (B, T), 0, vocab_size, dtype=jnp.int32)
    targets = jax.random.randint(k_tgt, (B, T), 0, vocab_size, dtype=jnp.int32)

    logits, loss = model(idx, targets)
    jax.block_until_ready((logits, loss))

    # Plain-JAX reference (matches PyTorch semantics).
    ref_logits = model.weight[idx]                            # (B, T, V)
    ref_flat = ref_logits.reshape(B * T, vocab_size)
    tgt_flat = targets.reshape(B * T)
    log_probs = jax.nn.log_softmax(ref_flat, axis=-1)
    ref_loss = -jnp.mean(log_probs[jnp.arange(B * T), tgt_flat])

    assert logits.shape == (B * T, vocab_size)
    assert jnp.allclose(logits, ref_flat, atol=1e-4), "logits mismatch"
    assert jnp.allclose(loss, ref_loss, atol=1e-4), "loss mismatch"

    # targets=None path: no CE work, loss must be None, logits shape (B, T, V).
    logits_only, none_loss = model(idx, None)
    jax.block_until_ready(logits_only)
    assert none_loss is None
    assert logits_only.shape == (B, T, vocab_size)
    assert jnp.allclose(logits_only, ref_logits, atol=1e-4)

    print("KERNEL_OK")
</pallas_src>

<mosaic_0001>
module attributes {stable_mosaic.version = 11 : i64} {
  func.func @kernel(%arg0: i32, %arg1: memref<16x1xi32, #tpu.memory_space<vmem>>, %arg2: memref<16x1xi32, #tpu.memory_space<vmem>>, %arg3: memref<128x128xf32, #tpu.memory_space<vmem>>, %arg4: memref<16x128xf32, #tpu.memory_space<vmem>>, %arg5: memref<1x1x128xf32, #tpu.memory_space<vmem>>) attributes {dimension_semantics = [#tpu.dimension_semantics<parallel>], iteration_bounds = array<i64: 1>, scalar_prefetch = 0 : i64, scratch_operands = 0 : i64, tpu.core_type = #tpu.core_type<tc>, window_params = [{transform_indices = @transform_0, window_bounds = array<i64: 16, 1>}, {transform_indices = @transform_1, window_bounds = array<i64: 16, 1>}, {pipeline_mode = #tpu.pipeline_mode<synchronous>, transform_indices = @transform_2, window_bounds = array<i64: 128, 128>}, {transform_indices = @transform_3, window_bounds = array<i64: 16, 128>}, {transform_indices = @transform_4, window_bounds = array<i64: 1, 1, 128>}]} {
    %c0 = arith.constant 0 : index
    %c0_0 = arith.constant 0 : index
    %0 = vector.load %arg1[%c0, %c0_0] : memref<16x1xi32, #tpu.memory_space<vmem>>, vector<16x1xi32>
    %c0_1 = arith.constant 0 : index
    %c0_2 = arith.constant 0 : index
    %1 = vector.load %arg2[%c0_1, %c0_2] : memref<16x1xi32, #tpu.memory_space<vmem>>, vector<16x1xi32>
    %c0_3 = arith.constant 0 : index
    %c0_4 = arith.constant 0 : index
    %2 = vector.load %arg3[%c0_3, %c0_4] : memref<128x128xf32, #tpu.memory_space<vmem>>, vector<128x128xf32>
    %3 = tpu.iota {dimensions = array<i32: 1>} : vector<16x128xi32>
    %4 = vector.broadcast %0 : vector<16x1xi32> to vector<16x128xi32>
    %5 = arith.cmpi eq, %3, %4 : vector<16x128xi32>
    %6 = arith.extui %5 : vector<16x128xi1> to vector<16x128xi32>
    %7 = arith.sitofp %6 : vector<16x128xi32> to vector<16x128xf32>
    %cst = arith.constant dense<0.000000e+00> : vector<16x128xf32>
    %8 = tpu.matmul %7, %2, %cst {dimension_numbers = #tpu.dot_dimension_numbers<[1], [0], [0], [1], [0, 0, 1, 1], [], []>, precision = #tpu.contract_precision<fp32>} : vector<16x128xf32>, vector<128x128xf32>, vector<16x128xf32> -> vector<16x128xf32>
    %c0_5 = arith.constant 0 : index
    %c0_6 = arith.constant 0 : index
    %9 = vector.load %arg4[%c0_5, %c0_6] : memref<16x128xf32, #tpu.memory_space<vmem>>, vector<16x128xf32>
    tpu.vector_store %arg4[%c0_5, %c0_6], %8 {strides = array<i32>} : memref<16x128xf32, #tpu.memory_space<vmem>>, vector<16x128xf32>,
    %cst_7 = arith.constant dense<0xFF800000> : vector<16xf32>
    %10 = vector.multi_reduction <maximumf>, %8, %cst_7 [1] : vector<16x128xf32> to vector<16xf32>
    %11 = vector.shape_cast %10 : vector<16xf32> to vector<16x1xf32>
    %12 = vector.broadcast %11 : vector<16x1xf32> to vector<16x128xf32>
    %13 = arith.subf %8, %12 : vector<16x128xf32>
    %14 = math.exp %13 : vector<16x128xf32>
    %cst_8 = arith.constant dense<0.000000e+00> : vector<16xf32>
    %15 = vector.multi_reduction <add>, %14, %cst_8 [1] : vector<16x128xf32> to vector<16xf32>
    %16 = vector.shape_cast %15 : vector<16xf32> to vector<16x1xf32>
    %17 = math.log %16 : vector<16x1xf32>
    %18 = arith.addf %11, %17 : vector<16x1xf32>
    %19 = vector.broadcast %1 : vector<16x1xi32> to vector<16x128xi32>
    %20 = arith.cmpi eq, %3, %19 : vector<16x128xi32>
    %cst_9 = arith.constant 0.000000e+00 : f32
    %21 = vector.broadcast %cst_9 : f32 to vector<16x128xf32>
    %22 = arith.select %20, %8, %21 : vector<16x128xi1>, vector<16x128xf32>
    %cst_10 = arith.constant dense<0.000000e+00> : vector<16xf32>
    %23 = vector.multi_reduction <add>, %22, %cst_10 [1] : vector<16x128xf32> to vector<16xf32>
    %24 = vector.shape_cast %23 : vector<16xf32> to vector<16x1xf32>
    %25 = arith.subf %18, %24 : vector<16x1xf32>
    %c16_i32 = arith.constant 16 : i32
    %26 = arith.muli %arg0, %c16_i32 : i32
    %27 = tpu.iota {dimensions = array<i32: 0>} : vector<16x128xi32>
    %28 = vector.broadcast %26 : i32 to vector<16x128xi32>
    %29 = arith.addi %28, %27 : vector<16x128xi32>
    %30 = vector.shape_cast %25 : vector<16x1xf32> to vector<16x1xf32>
    %31 = vector.broadcast %30 : vector<16x1xf32> to vector<16x128xf32>
    %c16_i32_11 = arith.constant 16 : i32
    %32 = vector.broadcast %c16_i32_11 : i32 to vector<16x128xi32>
    %33 = arith.cmpi slt, %29, %32 : vector<16x128xi32>
    %cst_12 = arith.constant 0.000000e+00 : f32
    %34 = vector.broadcast %cst_12 : f32 to vector<16x128xf32>
    %35 = arith.select %33, %31, %34 : vector<16x128xi1>, vector<16x128xf32>
    %cst_13 = arith.constant dense<0.000000e+00> : vector<128xf32>
    %36 = vector.multi_reduction <add>, %35, %cst_13 [0] : vector<16x128xf32> to vector<128xf32>
    %37 = vector.shape_cast %36 : vector<128xf32> to vector<1x128xf32>
    %c0_14 = arith.constant 0 : index
    %c0_15 = arith.constant 0 : index
    %c0_16 = arith.constant 0 : index
    %38 = vector.load %arg5[%c0_14, %c0_15, %c0_16] : memref<1x1x128xf32, #tpu.memory_space<vmem>>, vector<1x1x128xf32>
    %39 = vector.shape_cast %38 : vector<1x1x128xf32> to vector<1x128xf32>
    %40 = vector.shape_cast %37 : vector<1x128xf32> to vector<1x1x128xf32>
    tpu.vector_store %arg5[%c0_14, %c0_15, %c0_16], %40 {strides = array<i32>} : memref<1x1x128xf32, #tpu.memory_space<vmem>>, vector<1x1x128xf32>,
    return
  }
  func.func @transform_0(%arg0: i32) -> (i32, i32) {
    %c0_i32 = arith.constant 0 : i32
    %c0_i32_0 = arith.constant 0 : i32
    return %arg0, %c0_i32 : i32, i32
  }
  func.func @transform_1(%arg0: i32) -> (i32, i32) {
    %c0_i32 = arith.constant 0 : i32
    %c0_i32_0 = arith.constant 0 : i32
    return %arg0, %c0_i32 : i32, i32
  }
  func.func @transform_2(%arg0: i32) -> (i32, i32) {
    %c0_i32 = arith.constant 0 : i32
    %c0_i32_0 = arith.constant 0 : i32
    %c0_i32_1 = arith.constant 0 : i32
    return %c0_i32, %c0_i32_0 : i32, i32
  }
  func.func @transform_3(%arg0: i32) -> (i32, i32) {
    %c0_i32 = arith.constant 0 : i32
    %c0_i32_0 = arith.constant 0 : i32
    return %arg0, %c0_i32 : i32, i32
  }
  func.func @transform_4(%arg0: i32) -> (i32, i32, i32) {
    %c0_i32 = arith.constant 0 : i32
    %c0_i32_0 = arith.constant 0 : i32
    %c0_i32_1 = arith.constant 0 : i32
    return %arg0, %c0_i32, %c0_i32_0 : i32, i32, i32
  }
}

</mosaic_0001>

<bundles_post_ra>
// kernel: tpu_custom_call.1
= control target key start
LH: loop header
LB: loop body
LE: loop exit
PB: predicated region body
PF: predicated region fallthrough
CT: control target
= control target key end

     0   :  { %10 = vsyncpa [#allocation3], 0  ;;  %s1675_s0 = inlined_call_operand.vmem [shape: s32[16,1], index: 0, kind: input, shape index: {}]   ;;  %s1676_s1 = inlined_call_operand.vmem [shape: s32[16,1], index: 1, kind: input, shape index: {}]   ;;  %s1677_s2 = inlined_call_operand.hbm [shape: f32[128,128], index: 2, kind: input, shape index: {}]   ;;  %s1678_s3 = inlined_call_operand.hbm [shape: f32[16,128], index: 3, kind: output, shape index: {0}]   ;;  %s1679_s4 = inlined_call_operand.hbm [shape: f32[1,1,128], index: 4, kind: output, shape index: {1}]  }
   0x1   :  { %11 = vsyncpa [#allocation4], 0 }
   0x2   :  { %12 = vsyncpa [#allocation7], 0  ;;  %s1248_s15 = smov [#allocation2]  }
   0x3   :  { %s22_s16 = sshll.u32 %s1248_s15, 4  ;;  %s23_s16 = int_to_ptr.vmem [resolvable:$true] %s22_s16 }
   0x4   :  { %s1190_s17 = scalar_lea.vmem %s23_s16, 2048  ;;  %p1195_p1 = scmp.lt.s32.totalorder %s23_s16, %s23_s16 }
   0x5   :  { %p1191_p0 = scmp.ne.s32.totalorder %s23_s16, %s1190_s17  ;;  %p1196_p2 = scmp.lt.s32.totalorder %s1190_s17, %s1190_s17 }
   0x7   :  { %p1197_p3 = por %p1196_p2, %p1195_p1 }
   0x9   :  { %p1198_p4 = pnand %p1197_p3, %p1191_p0 }
   0xb   :  { %1201 = shalt.err (!%p1198_p4)
}
   0xc   :  { %s1249_s18 = smov 128   ;;  %s1250_s19 = smov 8  }
   0xd   :  { %28 = dma.hbm_to_vmem [thread:$0]  %s1677_s2, 2048, %s23_s16, [#allocation3], %s1249_s18, %s1249_s18, %s1250_s19  }
   0xe   :  { %1242 = dma.done.wait [#allocation3], 2048  }
   0xf   :  { %1243 = vsyncadd [#allocation3], 4294965248  ;;  %v1251_v0 = vmov 0   ;;  %v32_v1 = vld [vmem:[%s1675_s0] sm:$0xff]  ;;  %v33_v2 = vld [vmem:[%s1675_s0 + $0x8] sm:$0xff] }
  0x10   :  { %1172 = vset.pattern.permute.xlu0 %v1251_v0  ;;  %1173 = vset.pattern.permute.xlu1 %v1251_v0  ;;  %v51_v3 = vld [vmem:[#allocation2 + $0x78] sm:$0xff]  ;;  %v50_v4 = vld [vmem:[#allocation2 + $0x70] sm:$0xff]  ;;  %v49_v5 = vld [vmem:[#allocation2 + $0x68] sm:$0xff] }
  0x11   :  { %55 = vperm.xlu0 %1172, %v32_v1   ;;  %v1293_v6 = vand.u32 4294901760, %v51_v3  ;;  %v1295_v7 = vand.u32 4294901760, %v50_v4  ;;  %v1297_v8 = vand.u32 4294901760, %v49_v5  ;;  %v48_v9 = vld [vmem:[#allocation2 + $0x60] sm:$0xff]  ;;  %v47_v10 = vld [vmem:[#allocation2 + $0x58] sm:$0xff]  ;;  %v46_v11 = vld [vmem:[#allocation2 + $0x50] sm:$0xff] }
  0x12   :  { %v1299_v12 = vand.u32 4294901760, %v48_v9  ;;  %v1301_v13 = vand.u32 4294901760, %v47_v10  ;;  %v1303_v14 = vand.u32 4294901760, %v46_v11  ;;  %v45_v15 = vld [vmem:[#allocation2 + $0x48] sm:$0xff]  ;;  %v44_v16 = vld [vmem:[#allocation2 + $0x40] sm:$0xff]  ;;  %v43_v37 = vld [vmem:[#allocation2 + $0x38] sm:$0xff] }
  0x13   :  { %v1306_v17 = vsub.f32 %v51_v3, %v1293_v6  ;;  %v1309_v18 = vsub.f32 %v50_v4, %v1295_v7  ;;  %v1312_v19 = vsub.f32 %v49_v5, %v1297_v8  ;;  %954 = vmatprep.subr.mxu0 %v1293_v6  ;;  %v1315_v20 = vand.u32 4294901760, %v45_v15  ;;  %v34_v25 = vld [vmem:[%s1676_s1] sm:$0xff]  ;;  %v42_v38 = vld [vmem:[#allocation2 + $0x30] sm:$0xff]  ;;  %v41_v39 = vld [vmem:[#allocation2 + $0x28] sm:$0xff] }
  0x14   :  { %v1318_v21 = vsub.f32 %v48_v9, %v1299_v12  ;;  %v1321_v22 = vsub.f32 %v47_v10, %v1301_v13  ;;  %955 = vmatpush3.msra.mxu0 %v1293_v6  ;;  %v1325_v23 = vsub.f32 %v46_v11, %v1303_v14  ;;  %v1327_v24 = vand.u32 4294901760, %v44_v16  ;;  %v40_v45 = vld [vmem:[#allocation2 + $0x20] sm:$0xff]  ;;  %v39_v52 = vld [vmem:[#allocation2 + $0x18] sm:$0xff]  ;;  %v38_v58 = vld [vmem:[#allocation2 + $0x10] sm:$0xff] }
  0x15   :  { %58 = vperm.xlu0 %1172, %v33_v2   ;;  %v1333_v26 = vand.u32 4294901760, %v1306_v17  ;;  %v1336_v27 = vand.u32 4294901760, %v1309_v18  ;;  %v1339_v28 = vand.u32 4294901760, %v1312_v19  ;;  %956 = vmatprep.subr.mxu0 %v1295_v7  ;;  %v1350_v31 = vsub.f32 %v45_v15, %v1315_v20  ;;  %v37_v0 = vld [vmem:[#allocation2 + $0x8] sm:$0xff]  ;;  %v36_v9 = vld [vmem:[#allocation2] sm:$0xff] }
  0x16   :  { %v1343_v29 = vand.u32 4294901760, %v1318_v21  ;;  %v1346_v30 = vand.u32 4294901760, %v1321_v22  ;;  %957 = vmatpush3.msra.mxu0 %v1295_v7  ;;  %v1360_v35 = vand.u32 4294901760, %v1325_v23  ;;  %v1364_v36 = vsub.f32 %v44_v16, %v1327_v24 }
  0x17   :  { %v171_v32 = vsub.f32 %v1306_v17, %v1333_v26  ;;  %v178_v33 = vsub.f32 %v1309_v18, %v1336_v27  ;;  %v185_v34 = vsub.f32 %v1312_v19, %v1339_v28  ;;  %958 = vmatprep.subr.mxu0 %v1297_v8  ;;  %v1372_v44 = vand.u32 4294901760, %v1350_v31 }
  0x18   :  { %959 = vmatpush3.msra.mxu0 %v1297_v8  ;;  %v192_v42 = vsub.f32 %v1318_v21, %v1343_v29  ;;  %v199_v43 = vsub.f32 %v1321_v22, %v1346_v30  ;;  %v1375_v47 = vand.u32 4294901760, %v43_v37  ;;  %v1378_v48 = vand.u32 4294901760, %v42_v38 }
  0x19   :  { %773 = vperm.xlu0 %1172, %v34_v25   ;;  %v172_v40 = vand.u32 4294901760, %v171_v32  ;;  %v179_v41 = vand.u32 4294901760, %v178_v33  ;;  %960 = vmatprep.subr.mxu0 %v1299_v12  ;;  %v186_v46 = vand.u32 4294901760, %v185_v34  ;;  %v1380_v49 = vand.u32 4294901760, %v41_v39 }
  0x1a   :  { %961 = vmatpush3.msra.mxu0 %v1299_v12  ;;  %v206_v50 = vsub.f32 %v1325_v23, %v1360_v35  ;;  %v1385_v51 = vand.u32 4294901760, %v1364_v36  ;;  %v193_v53 = vand.u32 4294901760, %v192_v42  ;;  %v1389_v54 = vsub.f32 %v43_v37, %v1375_v47 }
  0x1b   :  { %989 = vmatprep.subr.mxu1 %v172_v40  ;;  %962 = vmatprep.subr.mxu0 %v1301_v13  ;;  %v1392_v55 = vsub.f32 %v42_v38, %v1378_v48  ;;  %v1395_v56 = vand.u32 4294901760, %v40_v45  ;;  %v213_v57 = vsub.f32 %v1350_v31, %v1372_v44  ;;  %v200_v59 = vand.u32 4294901760, %v199_v43 }
  0x1c   :  { %990 = vmatpush3.msra.mxu1 %v172_v40  ;;  %963 = vmatpush3.msra.mxu0 %v1301_v13  ;;  %v1401_v60 = vand.u32 4294901760, %v1389_v54  ;;  %v1404_v61 = vsub.f32 %v41_v39, %v1380_v49  ;;  %v1407_v62 = vand.u32 4294901760, %v39_v52  ;;  %v220_v63 = vsub.f32 %v1364_v36, %v1385_v51 }
  0x1d   :  { %991 = vmatprep.subr.mxu1 %v179_v41  ;;  %964 = vmatprep.subr.mxu0 %v1303_v14  ;;  %v207_v1 = vand.u32 4294901760, %v206_v50  ;;  %v1413_v2 = vand.u32 4294901760, %v1392_v55  ;;  %v1416_v3 = vsub.f32 %v40_v45, %v1395_v56  ;;  %v1419_v4 = vand.u32 4294901760, %v38_v58 }
  0x1e   :  { %992 = vmatpush3.msra.mxu1 %v179_v41  ;;  %965 = vmatpush3.msra.mxu0 %v1303_v14  ;;  %v214_v5 = vand.u32 4294901760, %v213_v57  ;;  %v227_v10 = vsub.f32 %v1389_v54, %v1401_v60  ;;  %v1425_v11 = vand.u32 4294901760, %v1404_v61  ;;  %v1428_v15 = vsub.f32 %v39_v52, %v1407_v62 }
  0x1f   :  { %993 = vmatprep.subr.mxu1 %v186_v46  ;;  %966 = vmatprep.subr.mxu0 %v1315_v20  ;;  %v1431_v16 = vand.u32 4294901760, %v37_v0  ;;  %v221_v25 = vand.u32 4294901760, %v220_v63  ;;  %v234_v32 = vsub.f32 %v1392_v55, %v1413_v2  ;;  %v1437_v33 = vand.u32 4294901760, %v1416_v3 }
  0x20   :  { %994 = vmatpush3.msra.mxu1 %v186_v46  ;;  %967 = vmatpush3.msra.mxu0 %v1315_v20  ;;  %v1440_v34 = vsub.f32 %v38_v58, %v1419_v4  ;;  %v1443_v37 = vand.u32 4294901760, %v36_v9  ;;  %v228_v38 = vand.u32 4294901760, %v227_v10  ;;  %v241_v39 = vsub.f32 %v1404_v61, %v1425_v11 }
  0x21   :  { %995 = vmatprep.subr.mxu1 %v193_v53  ;;  %968 = vmatprep.subr.mxu0 %v1327_v24  ;;  %v1449_v40 = vand.u32 4294901760, %v1428_v15  ;;  %v1452_v41 = vsub.f32 %v37_v0, %v1431_v16  ;;  %v235_v42 = vand.u32 4294901760, %v234_v32  ;;  %v248_v43 = vsub.f32 %v1416_v3, %v1437_v33 }
  0x22   :  { %996 = vmatpush3.msra.mxu1 %v193_v53  ;;  %969 = vmatpush3.msra.mxu0 %v1327_v24  ;;  %v1459_v45 = vand.u32 4294901760, %v1440_v34  ;;  %v1462_v46 = vsub.f32 %v36_v9, %v1443_v37  ;;  %v242_v50 = vand.u32 4294901760, %v241_v39  ;;  %v1252_v39 = vmov 0.0  }
  0x23   :  { %997 = vmatprep.subr.mxu1 %v200_v59  ;;  %970 = vmatprep.subr.mxu0 %v1375_v47  ;;  %v255_v52 = vsub.f32 %v1428_v15, %v1449_v40  ;;  %v1469_v53 = vand.u32 4294901760, %v1452_v41  ;;  %v249_v57 = vand.u32 4294901760, %v248_v43  ;;  %v1253_v43 = vmov 1.0  }
  0x24   :  { %998 = vmatpush3.msra.mxu1 %v200_v59  ;;  %971 = vmatpush3.msra.mxu0 %v1375_v47  ;;  %v262_v58 = vsub.f32 %v1440_v34, %v1459_v45  ;;  %v1476_v59 = vand.u32 4294901760, %v1462_v46 }
  0x25   :  { %999 = vmatprep.subr.mxu1 %v207_v1  ;;  %972 = vmatprep.subr.mxu0 %v1378_v48  ;;  %v256_v63 = vand.u32 4294901760, %v255_v52  ;;  %v269_v0 = vsub.f32 %v1452_v41, %v1469_v53 }
  0x26   :  { %1000 = vmatpush3.msra.mxu1 %v207_v1  ;;  %973 = vmatpush3.msra.mxu0 %v1378_v48  ;;  %v263_v1 = vand.u32 4294901760, %v262_v58 }
  0x27   :  { %1001 = vmatprep.subr.mxu1 %v214_v5  ;;  %974 = vmatprep.subr.mxu0 %v1380_v49  ;;  %v270_v9 = vand.u32 4294901760, %v269_v0 }
  0x28   :  { %1002 = vmatpush3.msra.mxu1 %v214_v5  ;;  %975 = vmatpush3.msra.mxu0 %v1380_v49  ;;  %v276_v5 = vsub.f32 %v1462_v46, %v1476_v59 }
  0x29   :  { %1003 = vmatprep.subr.mxu1 %v221_v25  ;;  %976 = vmatprep.subr.mxu0 %v1395_v56 }
  0x2a   :  { %1004 = vmatpush3.msra.mxu1 %v221_v25  ;;  %977 = vmatpush3.msra.mxu0 %v1395_v56  ;;  %v277_v10 = vand.u32 4294901760, %v276_v5  ;;  %v52_v25 = vlaneseq }
  0x2b   :  { %1005 = vmatprep.subr.mxu1 %v228_v38  ;;  %978 = vmatprep.subr.mxu0 %v1407_v62 }
  0x2c   :  { %1006 = vmatpush3.msra.mxu1 %v228_v38  ;;  %979 = vmatpush3.msra.mxu0 %v1407_v62  ;;  %v1490_v32 = vand.u32 127, %v52_v25 }
  0x2d   :  { %1007 = vmatprep.subr.mxu1 %v235_v42  ;;  %980 = vmatprep.subr.mxu0 %v1419_v4 }
  0x2e   :  { %1008 = vmatpush3.msra.mxu1 %v235_v42  ;;  %981 = vmatpush3.msra.mxu0 %v1419_v4 }
  0x2f   :  { %1009 = vmatprep.subr.mxu1 %v242_v50  ;;  %982 = vmatprep.subr.mxu0 %v1431_v16 }
  0x30   :  { %1010 = vmatpush3.msra.mxu1 %v242_v50  ;;  %983 = vmatpush3.msra.mxu0 %v1431_v16 }
  0x31   :  { %1011 = vmatprep.subr.mxu1 %v249_v57  ;;  %984 = vmatprep.subr.mxu0 %v1443_v37 }
  0x32   :  { %1012 = vmatpush3.msra.mxu1 %v249_v57  ;;  %985 = vmatpush3.msra.mxu0 %v1443_v37 }
  0x33   :  { %1013 = vmatprep.subr.mxu1 %v256_v63  ;;  %1024 = vmatprep.subr.mxu0 %v1306_v17 }
  0x34   :  { %1014 = vmatpush3.msra.mxu1 %v256_v63 }
  0x35   :  { %1015 = vmatprep.subr.mxu1 %v263_v1 }
  0x36   :  { %1016 = vmatpush3.msra.mxu1 %v263_v1 }
  0x37   :  { %1017 = vmatprep.subr.mxu1 %v270_v9 }
  0x38   :  { %1018 = vmatpush3.msra.mxu1 %v270_v9 }
  0x39   :  { %1019 = vmatprep.subr.mxu1 %v277_v10 }
  0x3a   :  { %1020 = vmatpush3.msra.mxu1 %v277_v10 }
  0x3b   :  { %1059 = vmatprep.subr.mxu1 %v1293_v6 }
  0x8c   :  { %v1492_v38 = vpop.permute.xlu0 %55 }
  0x8d   :  { %vm60_vm0 = vcmp.eq.s32.totalorder %v1490_v32, %v1492_v38 }
  0x8e   :  { %v838_v42 = vsel %vm60_vm0, 1.0, %v1252_v39  ;;  %1021 = vmatprep.mubr.msk.f32.mxu1 %vm60_vm0, %v1253_v43 }
  0x8f   :  { %v148_v50 = vsub.f32 %v838_v42, %v838_v42 }
  0x90   :  { %v1503_v52 = vpop.permute.xlu0 %58 }
  0x91   :  { %vm61_vm1 = vcmp.eq.s32.totalorder %v1490_v32, %v1503_v52  ;;  %v149_v57 = vand.u32 4294901760, %v148_v50 }
  0x92   :  { %v839_v58 = vsel %vm61_vm1, 1.0, %v1252_v39  ;;  %1022 = vmatmul.mubr.msk.f32.vlgmr.msra.gmra.mxu1 %vm61_vm1, %v1253_v43 }
  0x93   :  { %v1514_v63 = vsub.f32 %v839_v58, %v839_v58  ;;  %1060 = vmatpush3.msra.mxu1 %v1293_v6  ;;  %1091 = vmatprep.mubr.f32.mxu1 %v149_v57  ;;  %v150_v0 = vsub.f32 %v148_v50, %v149_v57 }
  0x94   :  { %1061 = vmatprep.subr.mxu1 %v1295_v7 }
  0x95   :  { %1062 = vmatpush3.msra.mxu1 %v1295_v7  ;;  %v151_v1 = vand.u32 4294901760, %v150_v0  ;;  %v159_v5 = vand.u32 4294901760, %v1514_v63 }
  0x96   :  { %1063 = vmatprep.subr.mxu1 %v1297_v8 }
  0x97   :  { %1064 = vmatpush3.msra.mxu1 %v1297_v8  ;;  %986 = vmatprep.mubr.f32.mxu0 %v151_v1  ;;  %v160_v9 = vsub.f32 %v1514_v63, %v159_v5 }
  0x98   :  { %1065 = vmatprep.subr.mxu1 %v1299_v12 }
  0x99   :  { %1066 = vmatpush3.msra.mxu1 %v1299_v12  ;;  %v161_v10 = vand.u32 4294901760, %v160_v9 }
  0x9a   :  { %1067 = vmatprep.subr.mxu1 %v1301_v13 }
  0x9b   :  { %1068 = vmatpush3.msra.mxu1 %v1301_v13  ;;  %987 = vmatmul.mubr.f32.vlgmr.msra.gmra.mxu0 %v161_v10 }
  0x9c   :  { %1025 = vmatpush3.msra.mxu0 %v1306_v17  ;;  %1069 = vmatprep.subr.mxu1 %v1303_v14 }
  0x9d   :  { %1026 = vmatprep.subr.mxu0 %v1309_v18  ;;  %1056 = vmatprep.mubr.f32.mxu0 %v148_v50 }
  0x9e   :  { %1070 = vmatpush3.msra.mxu1 %v1303_v14  ;;  %1027 = vmatpush3.msra.mxu0 %v1309_v18 }
  0x9f   :  { %1071 = vmatprep.subr.mxu1 %v1315_v20  ;;  %1028 = vmatprep.subr.mxu0 %v1312_v19 }
  0xa0   :  { %1072 = vmatpush3.msra.mxu1 %v1315_v20  ;;  %1029 = vmatpush3.msra.mxu0 %v1312_v19 }
  0xa1   :  { %1073 = vmatprep.subr.mxu1 %v1327_v24  ;;  %1030 = vmatprep.subr.mxu0 %v1318_v21 }
  0xa2   :  { %1074 = vmatpush3.msra.mxu1 %v1327_v24  ;;  %1031 = vmatpush3.msra.mxu0 %v1318_v21 }
  0xa3   :  { %1075 = vmatprep.subr.mxu1 %v1375_v47  ;;  %1032 = vmatprep.subr.mxu0 %v1321_v22 }
  0xa4   :  { %1076 = vmatpush3.msra.mxu1 %v1375_v47  ;;  %1033 = vmatpush3.msra.mxu0 %v1321_v22 }
  0xa5   :  { %1077 = vmatprep.subr.mxu1 %v1378_v48  ;;  %1034 = vmatprep.subr.mxu0 %v1325_v23 }
  0xa6   :  { %1078 = vmatpush3.msra.mxu1 %v1378_v48  ;;  %1035 = vmatpush3.msra.mxu0 %v1325_v23 }
  0xa7   :  { %1079 = vmatprep.subr.mxu1 %v1380_v49  ;;  %1036 = vmatprep.subr.mxu0 %v1350_v31 }
  0xa8   :  { %1080 = vmatpush3.msra.mxu1 %v1380_v49  ;;  %1037 = vmatpush3.msra.mxu0 %v1350_v31 }
  0xa9   :  { %1081 = vmatprep.subr.mxu1 %v1395_v56  ;;  %1038 = vmatprep.subr.mxu0 %v1364_v36 }
  0xaa   :  { %1082 = vmatpush3.msra.mxu1 %v1395_v56  ;;  %1039 = vmatpush3.msra.mxu0 %v1364_v36 }
  0xab   :  { %1083 = vmatprep.subr.mxu1 %v1407_v62  ;;  %1040 = vmatprep.subr.mxu0 %v1389_v54 }
  0xac   :  { %1084 = vmatpush3.msra.mxu1 %v1407_v62  ;;  %1041 = vmatpush3.msra.mxu0 %v1389_v54 }
  0xad   :  { %1085 = vmatprep.subr.mxu1 %v1419_v4  ;;  %1042 = vmatprep.subr.mxu0 %v1392_v55 }
  0xae   :  { %1086 = vmatpush3.msra.mxu1 %v1419_v4  ;;  %1043 = vmatpush3.msra.mxu0 %v1392_v55 }
  0xaf   :  { %1087 = vmatprep.subr.mxu1 %v1431_v16  ;;  %1044 = vmatprep.subr.mxu0 %v1404_v61 }
  0xb0   :  { %1088 = vmatpush3.msra.mxu1 %v1431_v16  ;;  %1045 = vmatpush3.msra.mxu0 %v1404_v61 }
  0xb1   :  { %1089 = vmatprep.subr.mxu1 %v1443_v37  ;;  %1046 = vmatprep.subr.mxu0 %v1416_v3 }
  0xb2   :  { %1090 = vmatpush3.msra.mxu1 %v1443_v37  ;;  %1047 = vmatpush3.msra.mxu0 %v1416_v3 }
  0xb3   :  { %1092 = vmatmul.mubr.f32.vlgmr.msra.gmra.mxu1 %v159_v5  ;;  %1129 = vmatprep.subr.mxu1 %v1293_v6 }
  0xb4   :  { %1048 = vmatprep.subr.mxu0 %v1428_v15  ;;  %1130 = vmatpush3.msra.mxu1 %v1293_v6 }
  0xb5   :  { %1161 = vmatprep.mubr.msk.f32.mxu1 %vm60_vm0, %v1253_v43  ;;  %1049 = vmatpush3.msra.mxu0 %v1428_v15 }
  0xb6   :  { %1131 = vmatprep.subr.mxu1 %v1295_v7  ;;  %1050 = vmatprep.subr.mxu0 %v1440_v34 }
  0xb7   :  { %1132 = vmatpush3.msra.mxu1 %v1295_v7  ;;  %1051 = vmatpush3.msra.mxu0 %v1440_v34 }
  0xb8   :  { %1133 = vmatprep.subr.mxu1 %v1297_v8  ;;  %1052 = vmatprep.subr.mxu0 %v1452_v41 }
  0xb9   :  { %1134 = vmatpush3.msra.mxu1 %v1297_v8  ;;  %1053 = vmatpush3.msra.mxu0 %v1452_v41 }
  0xba   :  { %1135 = vmatprep.subr.mxu1 %v1299_v12  ;;  %1054 = vmatprep.subr.mxu0 %v1462_v46 }
  0xbb   :  { %1136 = vmatpush3.msra.mxu1 %v1299_v12  ;;  %1055 = vmatpush3.msra.mxu0 %v1462_v46 }
  0xbc   :  { %1137 = vmatprep.subr.mxu1 %v1301_v13  ;;  %1057 = vmatmul.mubr.f32.vlgmr.msra.gmra.mxu0 %v1514_v63 }
  0xbd   :  { %1094 = vmatprep.subr.mxu0 %v1333_v26  ;;  %1138 = vmatpush3.msra.mxu1 %v1301_v13 }
  0xbe   :  { %1095 = vmatpush3.msra.mxu0 %v1333_v26  ;;  %1126 = vmatprep.mubr.msk.f32.mxu0 %vm60_vm0, %v1253_v43 }
  0xbf   :  { %1139 = vmatprep.subr.mxu1 %v1303_v14  ;;  %1096 = vmatprep.subr.mxu0 %v1336_v27 }
  0xc0   :  { %1140 = vmatpush3.msra.mxu1 %v1303_v14  ;;  %1097 = vmatpush3.msra.mxu0 %v1336_v27 }
  0xc1   :  { %1141 = vmatprep.subr.mxu1 %v1315_v20  ;;  %1098 = vmatprep.subr.mxu0 %v1339_v28 }
  0xc2   :  { %1142 = vmatpush3.msra.mxu1 %v1315_v20  ;;  %1099 = vmatpush3.msra.mxu0 %v1339_v28 }
  0xc3   :  { %1143 = vmatprep.subr.mxu1 %v1327_v24  ;;  %1100 = vmatprep.subr.mxu0 %v1343_v29 }
  0xc4   :  { %1144 = vmatpush3.msra.mxu1 %v1327_v24  ;;  %1101 = vmatpush3.msra.mxu0 %v1343_v29 }
  0xc5   :  { %1145 = vmatprep.subr.mxu1 %v1375_v47  ;;  %1102 = vmatprep.subr.mxu0 %v1346_v30 }
  0xc6   :  { %1146 = vmatpush3.msra.mxu1 %v1375_v47  ;;  %1103 = vmatpush3.msra.mxu0 %v1346_v30 }
  0xc7   :  { %1147 = vmatprep.subr.mxu1 %v1378_v48  ;;  %1104 = vmatprep.subr.mxu0 %v1360_v35 }
  0xc8   :  { %1148 = vmatpush3.msra.mxu1 %v1378_v48  ;;  %1105 = vmatpush3.msra.mxu0 %v1360_v35 }
  0xc9   :  { %1149 = vmatprep.subr.mxu1 %v1380_v49  ;;  %1106 = vmatprep.subr.mxu0 %v1372_v44 }
  0xca   :  { %1150 = vmatpush3.msra.mxu1 %v1380_v49  ;;  %1107 = vmatpush3.msra.mxu0 %v1372_v44  ;;  %v35_v44 = vld [vmem:[%s1676_s1 + $0x8] sm:$0xff]  ;;  %s1254_s1 = smov [#allocation5]  }
  0xcb   :  { %1151 = vmatprep.subr.mxu1 %v1395_v56  ;;  %1108 = vmatprep.subr.mxu0 %v1385_v51  ;;  %s812_s28 = sshll.u32 %s1254_s1, 4  ;;  %s813_s28 = int_to_ptr.vmem [resolvable:$true] %s812_s28 }
  0xcc   :  { %1152 = vmatpush3.msra.mxu1 %v1395_v56  ;;  %1109 = vmatpush3.msra.mxu0 %v1385_v51  ;;  %s1202_s29 = scalar_lea.vmem %s813_s28, 256  ;;  %p1207_p6 = scmp.lt.s32.totalorder %s813_s28, %s813_s28 }
  0xcd   :  { %1153 = vmatprep.subr.mxu1 %v1407_v62  ;;  %1110 = vmatprep.subr.mxu0 %v1401_v60  ;;  %p1203_p5 = scmp.ne.s32.totalorder %s813_s28, %s1202_s29  ;;  %p1208_p7 = scmp.lt.s32.totalorder %s1202_s29, %s1202_s29 }
  0xce   :  { %1154 = vmatpush3.msra.mxu1 %v1407_v62  ;;  %1111 = vmatpush3.msra.mxu0 %v1401_v60  ;;  %v774_v60 = vpop.permute.xlu0 %773 }
  0xcf   :  { %1155 = vmatprep.subr.mxu1 %v1419_v4  ;;  %1112 = vmatprep.subr.mxu0 %v1413_v2  ;;  %vm778_vm2 = vcmp.eq.s32.totalorder %v1490_v32, %v774_v60  ;;  %p1209_p8 = por %p1208_p7, %p1207_p6 }
  0xd0   :  { %1156 = vmatpush3.msra.mxu1 %v1419_v4  ;;  %1113 = vmatpush3.msra.mxu0 %v1413_v2 }
  0xd1   :  { %1157 = vmatprep.subr.mxu1 %v1431_v16  ;;  %1114 = vmatprep.subr.mxu0 %v1425_v11  ;;  %p1210_p9 = pnand %p1209_p8, %p1203_p5 }
  0xd2   :  { %1158 = vmatpush3.msra.mxu1 %v1431_v16  ;;  %1115 = vmatpush3.msra.mxu0 %v1425_v11 }
  0xd3   :  { %1159 = vmatprep.subr.mxu1 %v1443_v37  ;;  %1116 = vmatprep.subr.mxu0 %v1437_v33 }
  0xd4   :  { %1160 = vmatpush3.msra.mxu1 %v1443_v37  ;;  %1117 = vmatpush3.msra.mxu0 %v1437_v33 }
  0xd5   :  { %1162 = vmatmul.mubr.msk.f32.vlgmr.msra.gmra.mxu1 %vm61_vm1, %v1253_v43  ;;  %1118 = vmatprep.subr.mxu0 %v1449_v40 }
  0xd6   :  { %1119 = vmatpush3.msra.mxu0 %v1449_v40 }
  0xd7   :  { %1120 = vmatprep.subr.mxu0 %v1459_v45 }
  0xd8   :  { %1121 = vmatpush3.msra.mxu0 %v1459_v45 }
  0xd9   :  { %1122 = vmatprep.subr.mxu0 %v1469_v53 }
  0xda   :  { %1123 = vmatpush3.msra.mxu0 %v1469_v53 }
  0xdb   :  { %1124 = vmatprep.subr.mxu0 %v1476_v59 }
  0xdc   :  { %1125 = vmatpush3.msra.mxu0 %v1476_v59 }
  0xdd   :  { %1127 = vmatmul.mubr.msk.f32.vlgmr.msra.gmra.mxu0 %vm61_vm1, %v1253_v43 }
 0x152   :  { %v1023_v7 = vpop.f32.mrf.mxu1 }
 0x154   :  { %v314_v13 = vpop.f32.mrf.mxu1 }
 0x15b   :  { %v988_v6 = vpop.f32.mrf.mxu0 }
 0x15c   :  { %v321_v14 = vadd.f32 %v1023_v7, %v988_v6 }
 0x15d   :  { %v153_v8 = vpop.f32.mrf.mxu0 }
 0x15e   :  { %v315_v19 = vadd.f32 %v314_v13, %v153_v8 }
 0x173   :  { %v1093_v17 = vpop.f32.mrf.mxu1 }
 0x175   :  { %v520_v22 = vpop.f32.mrf.mxu1 }
 0x17c   :  { %v1058_v12 = vpop.f32.mrf.mxu0 }
 0x17d   :  { %v432_v20 = vadd.f32 %v1058_v12, %v321_v14 }
 0x17e   :  { %v424_v18 = vpop.f32.mrf.mxu0 }
 0x17f   :  { %v425_v21 = vadd.f32 %v424_v18, %v315_v19  ;;  %v529_v23 = vadd.f32 %v1093_v17, %v432_v20 }
 0x181   :  { %v521_v28 = vadd.f32 %v520_v22, %v425_v21 }
 0x195   :  { %v1163_v24 = vpop.f32.mrf.mxu1 }
 0x197   :  { %v740_v35 = vpop.f32.mrf.mxu1 }
 0x19d   :  { %v1128_v26 = vpop.f32.mrf.mxu0 }
 0x19e   :  { %v654_v27 = vadd.f32 %v1128_v26, %v529_v23 }
 0x19f   :  { %v647_v29 = vpop.f32.mrf.mxu0 }
 0x1a0   :  { %v747_v30 = vadd.f32 %v1163_v24, %v654_v27  ;;  %v648_v31 = vadd.f32 %v647_v29, %v521_v28 }
 0x1a2   :  { %751 = vst [vmem:[#allocation5 + $0x8] sm:$0xff] %v747_v30  ;;  %v741_v36 = vadd.f32 %v740_v35, %v648_v31 }
 0x1a4   :  { %750 = vst [vmem:[#allocation5] sm:$0xff] %v741_v36  ;;  %752 = vmax.xlane.f32.xlu1 %v741_v36  ;;  %v780_v2 = vsel %vm778_vm2, %v741_v36, 0.0 }
 0x1a8   :  { %754 = vmax.xlane.f32.xlu1 %v747_v30 }
 0x1b9   :  { %776 = vperm.xlu1 %1173, %v35_v44  }
 0x22d   :  { %v753_v47 = vpop.xlane.xlu1 %752 }
 0x22e   :  { %v756_v48 = vsub.f32 %v741_v36, %v753_v47 }
 0x230   :  { %v758_v49 = vmul.f32 1.442695, %v756_v48 }
 0x231   :  { %v755_v51 = vpop.xlane.xlu1 %754 }
 0x232   :  { %1174 = vpow2.f32 %v758_v49  ;;  %v757_v54 = vsub.f32 %v747_v30, %v755_v51 }
 0x234   :  { %v760_v55 = vmul.f32 1.442695, %v757_v54 }
 0x235   :  { %v777_v61 = vpop.permute.xlu1 %776 }
 0x236   :  { %1176 = vpow2.f32 %v760_v55  ;;  %vm779_vm3 = vcmp.eq.s32.totalorder %v1490_v32, %v777_v61 }
 0x237   :  { %v781_v3 = vsel %vm779_vm3, %v747_v30, 0.0 }
 0x23f   :  { %v1175_v56 = vpop.eup %1174 }
 0x240   :  { %762 = vadd.xlane.f32.xlu0 %v1175_v56 }
 0x243   :  { %v1177_v62 = vpop.eup %1176 }
 0x244   :  { %764 = vadd.xlane.f32.xlu1 %v1177_v62  ;;  %782 = vadd.xlane.f32.xlu0 %v780_v2 }
 0x248   :  { %784 = vadd.xlane.f32.xlu0 %v781_v3 }
 0x249   :  { %1213 = shalt.err (!%p1210_p9)
}
 0x24a   :  { %818 = dma.vmem_to_hbm [thread:$0]  %s813_s28, 256, %s1678_s3, [#allocation4], %s1249_s18, %s1249_s18, %s1250_s19  }
 0x24b   :  { %s1255_s3 = smov [#allocation6]  }
 0x24c   :  { %s825_s6 = sshll.u32 %s1255_s3, 4  ;;  %s826_s6 = int_to_ptr.vmem [resolvable:$true] %s825_s6 }
 0x24d   :  { %s1222_s7 = scalar_lea.vmem %s826_s6, 16  ;;  %s1226_s8 = scalar_lea.vmem %s826_s6, 32 }
 0x24e   :  { %p1223_p10 = scmp.ne.s32.totalorder %s826_s6, %s1222_s7  ;;  %p1227_p11 = scmp.lt.s32.totalorder %s826_s6, %s826_s6 }
 0x24f   :  { %p1228_p12 = scmp.lt.s32.totalorder %s1226_s8, %s1222_s7 }
 0x251   :  { %p1229_p13 = por %p1228_p12, %p1227_p11 }
 0x253   :  { %p1230_p0 = pnand %p1229_p13, %p1223_p10 }
 0x2c9   :  { %v763_v4 = vpop.xlane.xlu0 %762 }
 0x2ca   :  { %1178 = vlog2.f32 %v763_v4 }
 0x2cd   :  { %v765_v11 = vpop.xlane.xlu1 %764  ;;  %v783_v33 = vpop.xlane.xlu0 %782 }
 0x2ce   :  { %1180 = vlog2.f32 %v765_v11 }
 0x2d1   :  { %v785_v45 = vpop.xlane.xlu0 %784 }
 0x2d7   :  { %v1179_v15 = vpop.eup %1178 }
 0x2d8   :  { %v767_v16 = vmul.f32 0.6931472, %v1179_v15 }
 0x2da   :  { %v770_v40 = vadd.f32 %v767_v16, %v753_v47 }
 0x2db   :  { %v1181_v34 = vpop.eup %1180 }
 0x2dc   :  { %v769_v37 = vmul.f32 0.6931472, %v1181_v34  ;;  %v786_v46 = vsub.f32 %v770_v40, %v783_v33 }
 0x2de   :  { %v771_v41 = vadd.f32 %v769_v37, %v755_v51 }
 0x2e0   :  { %v787_v53 = vsub.f32 %v771_v41, %v785_v45 }
 0x2e2   :  { %v799_v59 = vadd.f32 %v787_v53, %v786_v46 }
 0x2e4   :  { %v800_v25 = vrot.slane %v799_v59, 4 }
 0x2e6   :  { %v801_v32 = vadd.f32 %v800_v25, %v799_v59 }
 0x2e8   :  { %v802_v38 = vrot.slane %v801_v32, 2 }
 0x2ea   :  { %v803_v39 = vadd.f32 %v802_v38, %v801_v32 }
 0x2ec   :  { %v804_v42 = vrot.slane %v803_v39, 1 }
 0x2ee   :  { %v805_v43 = vadd.f32 %v804_v42, %v803_v39 }
 0x2f0   :  { %806 = vst [vmem:[#allocation6] sm:$0x1] %v805_v43 }
 0x2f1   :  { %1233 = shalt.err (!%p1230_p0)
}
 0x2f2   :  { %828 = dma.vmem_to_hbm [thread:$0]  %s826_s6, 16, %s1679_s4, [#allocation7]  }
 0x2f3   :  { %1244 = dma.done.wait [#allocation4], 256  }
 0x2f4   :  { %1245 = vsyncadd [#allocation4], 4294967040 }
 0x2f5   :  { %1246 = dma.done.wait [#allocation7], 16  }
 0x2f6   :  { %1247 = vsyncadd [#allocation7], 4294967280 }
 0x2f7   :  { %835 = vsyncpa [#allocation3], 1 }
 0x2f8   :  { %836 = vsyncpa [#allocation4], 1 }
 0x2f9   :  { %837 = vsyncpa [#allocation7], 1 }

</bundles_post_ra>
